<compile_context>
chip_gen: v6e
topology: v6e:2x2x1
jax: 0.10.0
libtpu: 0.0.40
codegen_flags: <defaults>
</compile_context>

<pallas_src>
import jax
import jax.numpy as jnp
from jax.experimental import pallas as pl
from jax.experimental.pallas import tpu as pltpu

IN_DIM = 2048
HID_DIM = 512
OUT_DIM = 3
OUT_PAD = 8   # tiny minor-dim pad; block minor dim == full array dim -> legal


def _affine_kernel(x_ref, w_ref, b_ref, o_ref):
    # Fused affine map: [TB, 2048] @ [2048, 8] (bf16 on the MXU, f32 accumulate)
    # + bias, stored as f32.
    # TODO(synk): Dropout(0.2) is identity in eval mode; train-mode RNG masking
    # is intentionally not implemented.
    x = x_ref[...]
    if x.dtype != jnp.bfloat16:        # trace-time branch: cast only if needed
        x = x.astype(jnp.bfloat16)
    y = jnp.dot(x, w_ref[...], preferred_element_type=jnp.float32)
    o_ref[...] = (y + b_ref[...]).astype(o_ref.dtype)


def fuse_params(w1_t, b1, w2_t, b2):
    """Collapse Linear∘Dropout(eval)∘Linear into one affine map.

    Called ONCE at init (weights are static at inference).  Returns the fused
    weight in bf16 [2048, OUT_PAD] (~32 KiB HBM per call) and the fused bias in
    f32 [1, OUT_PAD].
    """
    w = w1_t @ w2_t                     # [2048, 3]
    b = b1 @ w2_t + b2                  # [3]
    w_pad = jnp.zeros((IN_DIM, OUT_PAD), jnp.float32).at[:, :OUT_DIM].set(w)
    b_pad = jnp.zeros((1, OUT_PAD), jnp.float32).at[0, :OUT_DIM].set(b)
    return w_pad.astype(jnp.bfloat16), b_pad


def _choose_tile(B, dtype):
    """Near-equal batch tiles, >=2 grid steps when B >= 16 (v7x megacore)."""
    # bf16 x tiles are half the VMEM -> allow bigger tiles; both settings keep
    # double-buffered x tiles under the 16 MiB v5e default scoped-VMEM limit.
    max_tb = 1024 if jnp.dtype(dtype) == jnp.dtype(jnp.bfloat16) else 512
    row_align = 16 if jnp.dtype(dtype) == jnp.dtype(jnp.bfloat16) else 8

    n = pl.cdiv(B, max_tb)
    if B >= 16:
        n = max(n, 2)                   # give both v7x TensorCores work
    tb = row_align * pl.cdiv(pl.cdiv(B, n), row_align)
    if tb >= B:
        return B, 1                     # single full-dim block (always legal)
    return tb, pl.cdiv(B, tb)


def branch2_forward(x, w_fused, b_fused):
    """x: [B, 2048] (bf16 preferred, f32 accepted) -> [B, 3] f32."""
    B = x.shape[0]
    TB, grid_n = _choose_tile(B, x.dtype)

    out = pl.pallas_call(
        _affine_kernel,
        out_shape=jax.ShapeDtypeStruct((B, OUT_PAD), jnp.float32),
        grid_spec=pltpu.PrefetchScalarGridSpec(
            num_scalar_prefetch=0,
            grid=(grid_n,),
            in_specs=[
                # x: tiled along batch -> pipelined DMAs; ragged last block is
                # masked by Pallas (no wrapper-side jnp.pad).
                pl.BlockSpec((TB, IN_DIM), lambda i: (i, 0)),
                # fused weight + bias: same block every step -> resident.
                pl.BlockSpec((IN_DIM, OUT_PAD), lambda i: (0, 0)),
                pl.BlockSpec((1, OUT_PAD), lambda i: (0, 0)),
            ],
            out_specs=pl.BlockSpec((TB, OUT_PAD), lambda i: (i, 0)),
        ),
        compiler_params=pltpu.CompilerParams(
            # Batch axis is fully independent -> shard across TCs on v7x.
            dimension_semantics=("parallel",),
        ),
    )(x, w_fused, b_fused)

    return out[:, :OUT_DIM]


def init_params(key):
    """Deterministic init mimicking nn.Linear default (U(-1/sqrt(fan_in), +))."""
    k1, k2, k3, k4 = jax.random.split(key, 4)
    bound1 = 1.0 / jnp.sqrt(IN_DIM)
    bound2 = 1.0 / jnp.sqrt(HID_DIM)
    # Stored directly in [in, out] (transposed vs. PyTorch's [out, in]).
    w1_t = jax.random.uniform(k1, (IN_DIM, HID_DIM), jnp.float32, -bound1, bound1)
    b1 = jax.random.uniform(k2, (HID_DIM,), jnp.float32, -bound1, bound1)
    w2_t = jax.random.uniform(k3, (HID_DIM, OUT_DIM), jnp.float32, -bound2, bound2)
    b2 = jax.random.uniform(k4, (OUT_DIM,), jnp.float32, -bound2, bound2)
    return w1_t, b1, w2_t, b2


def _check(x_bf16, out, w1_t, b1, w2_t, b2, w_fused, b_fused):
    B = x_bf16.shape[0]
    assert out.shape == (B, OUT_DIM)
    # Tight check: same bf16 inputs, accurate f32 matmul in plain JAX.
    x32 = x_bf16.astype(jnp.float32)
    w32 = w_fused[:, :OUT_DIM].astype(jnp.float32)
    ref_bf = jnp.matmul(x32, w32, precision=jax.lax.Precision.HIGHEST) \
        + b_fused[0, :OUT_DIM]
    assert jnp.allclose(out, ref_bf, atol=1e-3, rtol=1e-3)
    # Loose check: original f32 two-matmul reference (bf16 quantization +
    # reassociation -> tolerance-based).
    ref_f32 = (x32 @ w1_t + b1) @ w2_t + b2
    assert jnp.allclose(out, ref_f32, atol=3e-2, rtol=3e-2)


if __name__ == "__main__":
    key = jax.random.PRNGKey(0)
    kx, kx2, kp = jax.random.split(key, 3)

    w1_t, b1, w2_t, b2 = init_params(kp)
    # One-time parameter fusion (amortized over all forward calls).
    w_fused, b_fused = fuse_and_pad = fuse_params(w1_t, b1, w2_t, b2)

    # Small-batch case (B=8): single tile, latency regime.
    B = 8
    x = jax.random.normal(kx, (B, IN_DIM), jnp.float32)
    x_bf16 = x.astype(jnp.bfloat16)   # producer-side cast; ideally upstream emits bf16
    out = jax.block_until_ready(branch2_forward(x_bf16, w_fused, b_fused))
    _check(x_bf16, out, w1_t, b1, w2_t, b2, w_fused, b_fused)

    # Ragged multi-tile case (B=40 -> 2 grid steps, masked last block).
    B2 = 40
    x2 = jax.random.normal(kx2, (B2, IN_DIM), jnp.float32).astype(jnp.bfloat16)
    out2 = jax.block_until_ready(branch2_forward(x2, w_fused, b_fused))
    _check(x2, out2, w1_t, b1, w2_t, b2, w_fused, b_fused)

    print("KERNEL_OK")
</pallas_src>

<mosaic_0001>
module attributes {stable_mosaic.version = 11 : i64} {
  func.func @_affine_kernel(%arg0: i32, %arg1: memref<8x2048xbf16, #tpu.memory_space<vmem>>, %arg2: memref<2048x8xbf16, #tpu.memory_space<vmem>>, %arg3: memref<1x8xf32, #tpu.memory_space<vmem>>, %arg4: memref<8x8xf32, #tpu.memory_space<vmem>>) attributes {dimension_semantics = [#tpu.dimension_semantics<parallel>], iteration_bounds = array<i64: 1>, scalar_prefetch = 0 : i64, scratch_operands = 0 : i64, tpu.core_type = #tpu.core_type<tc>, window_params = [{transform_indices = @transform_0, window_bounds = array<i64: 8, 2048>}, {pipeline_mode = #tpu.pipeline_mode<synchronous>, transform_indices = @transform_1, window_bounds = array<i64: 2048, 8>}, {pipeline_mode = #tpu.pipeline_mode<synchronous>, transform_indices = @transform_2, window_bounds = array<i64: 1, 8>}, {transform_indices = @transform_3, window_bounds = array<i64: 8, 8>}]} {
    %c0 = arith.constant 0 : index
    %c0_0 = arith.constant 0 : index
    %0 = vector.load %arg1[%c0, %c0_0] : memref<8x2048xbf16, #tpu.memory_space<vmem>>, vector<8x2048xbf16>
    %c0_1 = arith.constant 0 : index
    %c0_2 = arith.constant 0 : index
    %1 = vector.load %arg2[%c0_1, %c0_2] : memref<2048x8xbf16, #tpu.memory_space<vmem>>, vector<2048x8xbf16>
    %cst = arith.constant dense<0.000000e+00> : vector<8x8xf32>
    %2 = tpu.matmul %0, %1, %cst {dimension_numbers = #tpu.dot_dimension_numbers<[1], [0], [0], [1], [0, 0, 1, 1], [], []>} : vector<8x2048xbf16>, vector<2048x8xbf16>, vector<8x8xf32> -> vector<8x8xf32>
    %c0_3 = arith.constant 0 : index
    %c0_4 = arith.constant 0 : index
    %3 = vector.load %arg3[%c0_3, %c0_4] : memref<1x8xf32, #tpu.memory_space<vmem>>, vector<1x8xf32>
    %4 = vector.broadcast %3 : vector<1x8xf32> to vector<8x8xf32>
    %5 = arith.addf %2, %4 : vector<8x8xf32>
    %c0_5 = arith.constant 0 : index
    %c0_6 = arith.constant 0 : index
    %6 = vector.load %arg4[%c0_5, %c0_6] : memref<8x8xf32, #tpu.memory_space<vmem>>, vector<8x8xf32>
    tpu.vector_store %arg4[%c0_5, %c0_6], %5 {strides = array<i32>} : memref<8x8xf32, #tpu.memory_space<vmem>>, vector<8x8xf32>,
    return
  }
  func.func @transform_0(%arg0: i32) -> (i32, i32) {
    %c0_i32 = arith.constant 0 : i32
    %c0_i32_0 = arith.constant 0 : i32
    return %arg0, %c0_i32 : i32, i32
  }
  func.func @transform_1(%arg0: i32) -> (i32, i32) {
    %c0_i32 = arith.constant 0 : i32
    %c0_i32_0 = arith.constant 0 : i32
    %c0_i32_1 = arith.constant 0 : i32
    return %c0_i32, %c0_i32_0 : i32, i32
  }
  func.func @transform_2(%arg0: i32) -> (i32, i32) {
    %c0_i32 = arith.constant 0 : i32
    %c0_i32_0 = arith.constant 0 : i32
    %c0_i32_1 = arith.constant 0 : i32
    return %c0_i32, %c0_i32_0 : i32, i32
  }
  func.func @transform_3(%arg0: i32) -> (i32, i32) {
    %c0_i32 = arith.constant 0 : i32
    %c0_i32_0 = arith.constant 0 : i32
    return %arg0, %c0_i32 : i32, i32
  }
}

</mosaic_0001>

<bundles_post_ra>
// kernel: tpu_custom_call.1
= control target key start
LH: loop header
LB: loop body
LE: loop exit
PB: predicated region body
PF: predicated region fallthrough
CT: control target
= control target key end

     0   :  { %s2370_s0 = inlined_call_operand.vmem [shape: bf16[8,2048], index: 0, kind: input, shape index: {}]   ;;  %s2371_s1 = inlined_call_operand.vmem [shape: bf16[2048,8], index: 1, kind: input, shape index: {}]   ;;  %s2372_s2 = inlined_call_operand.vmem [shape: f32[1,8], index: 2, kind: input, shape index: {}]   ;;  %s2373_s3 = inlined_call_operand.hbm [shape: f32[8,8], index: 3, kind: output, shape index: {}]  }
   0x1   :  { %v1769_v0 = vld [vmem:[%s2371_s1 + $0x78] sm:$0xff]   ;;  %v1773_v4 = vld [vmem:[%s2371_s1 + $0x70] sm:$0xff]   ;;  %v1777_v8 = vld [vmem:[%s2371_s1 + $0x68] sm:$0xff]  }
   0x2   :  { %v1770_v1 = vld [vmem:[%s2371_s1 + $0xf8] sm:$0xff]   ;;  %1592 = vmatprep.subr.bf16.mxu0 %v1769_v0  ;;  %v1774_v5 = vld [vmem:[%s2371_s1 + $0xf0] sm:$0xff]   ;;  %v1778_v9 = vld [vmem:[%s2371_s1 + $0xe8] sm:$0xff]  }
   0x3   :  { %v1771_v2 = vld [vmem:[%s2371_s1 + $0x38] sm:$0xff]   ;;  %1614 = vmatprep.subr.bf16.mxu1 %v1770_v1  ;;  %v1775_v6 = vld [vmem:[%s2371_s1 + $0x30] sm:$0xff]   ;;  %v1779_v10 = vld [vmem:[%s2371_s1 + $0x28] sm:$0xff]  }
   0x4   :  { %v1772_v3 = vld [vmem:[%s2371_s1 + $0xb8] sm:$0xff]   ;;  %1593 = vmatpush3.bf16.msra.mxu0 %v1771_v2  ;;  %v1776_v7 = vld [vmem:[%s2371_s1 + $0xb0] sm:$0xff]   ;;  %v1780_v11 = vld [vmem:[%s2371_s1 + $0xa8] sm:$0xff]  }
   0x5   :  { %1615 = vmatpush3.bf16.msra.mxu1 %v1772_v3  ;;  %1594 = vmatprep.subr.bf16.mxu0 %v1773_v4  ;;  %v1781_v12 = vld [vmem:[%s2371_s1 + $0x60] sm:$0xff]   ;;  %v1785_v16 = vld [vmem:[%s2371_s1 + $0x58] sm:$0xff]   ;;  %v1789_v20 = vld [vmem:[%s2371_s1 + $0x50] sm:$0xff]  }
   0x6   :  { %1616 = vmatprep.subr.bf16.mxu1 %v1774_v5  ;;  %v1782_v13 = vld [vmem:[%s2371_s1 + $0xe0] sm:$0xff]   ;;  %v1786_v17 = vld [vmem:[%s2371_s1 + $0xd8] sm:$0xff]   ;;  %v1790_v21 = vld [vmem:[%s2371_s1 + $0xd0] sm:$0xff]  }
   0x7   :  { %v1783_v14 = vld [vmem:[%s2371_s1 + $0x20] sm:$0xff]   ;;  %v1787_v18 = vld [vmem:[%s2371_s1 + $0x18] sm:$0xff]   ;;  %v1791_v22 = vld [vmem:[%s2371_s1 + $0x10] sm:$0xff]  }
   0x8   :  { %1595 = vmatpush3.bf16.msra.mxu0 %v1775_v6  ;;  %v1784_v15 = vld [vmem:[%s2371_s1 + $0xa0] sm:$0xff]   ;;  %v1788_v19 = vld [vmem:[%s2371_s1 + $0x98] sm:$0xff]   ;;  %v1792_v23 = vld [vmem:[%s2371_s1 + $0x90] sm:$0xff]  }
   0x9   :  { %1617 = vmatpush3.bf16.msra.mxu1 %v1776_v7  ;;  %1596 = vmatprep.subr.bf16.mxu0 %v1777_v8  ;;  %v1793_v24 = vld [vmem:[%s2371_s1 + $0x48] sm:$0xff]   ;;  %v1797_v28 = vld [vmem:[%s2371_s1 + $0x40] sm:$0xff]   ;;  %v1805_v38 = vld [vmem:[%s2371_s1 + $0x178] sm:$0xff]  }
   0xa   :  { %1618 = vmatprep.subr.bf16.mxu1 %v1778_v9  ;;  %v1794_v25 = vld [vmem:[%s2371_s1 + $0xc8] sm:$0xff]   ;;  %v1798_v29 = vld [vmem:[%s2371_s1 + $0xc0] sm:$0xff]   ;;  %v1806_v39 = vld [vmem:[%s2371_s1 + $0x1f8] sm:$0xff]  }
   0xb   :  { %v1795_v26 = vld [vmem:[%s2371_s1 + $0x8] sm:$0xff]   ;;  %v1799_v30 = vld [vmem:[%s2371_s1] sm:$0xff]   ;;  %v1807_v40 = vld [vmem:[%s2371_s1 + $0x138] sm:$0xff]  }
   0xc   :  { %1597 = vmatpush3.bf16.msra.mxu0 %v1779_v10  ;;  %v1796_v27 = vld [vmem:[%s2371_s1 + $0x88] sm:$0xff]   ;;  %v1800_v31 = vld [vmem:[%s2371_s1 + $0x80] sm:$0xff]   ;;  %v1808_v41 = vld [vmem:[%s2371_s1 + $0x1b8] sm:$0xff]  }
   0xd   :  { %1619 = vmatpush3.bf16.msra.mxu1 %v1780_v11  ;;  %1598 = vmatprep.subr.bf16.mxu0 %v1781_v12  ;;  %v16_v32 = vld [vmem:[%s2370_s0] sm:$0xff]  ;;  %v17_v33 = vld [vmem:[%s2370_s0 + $0x8] sm:$0xff]  ;;  %v1809_v42 = vld [vmem:[%s2371_s1 + $0x170] sm:$0xff]  }
   0xe   :  { %1620 = vmatprep.subr.bf16.mxu1 %v1782_v13  ;;  %v1448_v34 = vcombine.low %v16_v32, %v16_v32  ;;  %v1449_v35 = vcombine.high %v16_v32, %v16_v32  ;;  %v1450_v36 = vcombine.low %v17_v33, %v17_v33  ;;  %v1451_v37 = vcombine.high %v17_v33, %v17_v33  ;;  %v1810_v43 = vld [vmem:[%s2371_s1 + $0x1f0] sm:$0xff]   ;;  %v1813_v46 = vld [vmem:[%s2371_s1 + $0x168] sm:$0xff]   ;;  %v1817_v50 = vld [vmem:[%s2371_s1 + $0x160] sm:$0xff]  }
   0xf   :  { %v1811_v44 = vld [vmem:[%s2371_s1 + $0x130] sm:$0xff]   ;;  %v1814_v47 = vld [vmem:[%s2371_s1 + $0x1e8] sm:$0xff]   ;;  %v1818_v51 = vld [vmem:[%s2371_s1 + $0x1e0] sm:$0xff]  }
  0x10   :  { %1599 = vmatpush3.bf16.msra.mxu0 %v1783_v14  ;;  %1143 = vmatprep.mubr.bf16.mxu0 %v1449_v35  ;;  %v1812_v45 = vld [vmem:[%s2371_s1 + $0x1b0] sm:$0xff]   ;;  %v1815_v48 = vld [vmem:[%s2371_s1 + $0x128] sm:$0xff]   ;;  %v1819_v52 = vld [vmem:[%s2371_s1 + $0x120] sm:$0xff]  }
  0x11   :  { %1621 = vmatpush3.bf16.msra.mxu1 %v1784_v15  ;;  %1600 = vmatprep.subr.bf16.mxu0 %v1785_v16  ;;  %v1816_v49 = vld [vmem:[%s2371_s1 + $0x1a8] sm:$0xff]   ;;  %v1820_v53 = vld [vmem:[%s2371_s1 + $0x1a0] sm:$0xff]   ;;  %v1821_v54 = vld [vmem:[%s2371_s1 + $0x158] sm:$0xff]  }
  0x12   :  { %1622 = vmatprep.subr.bf16.mxu1 %v1786_v17  ;;  %1183 = vmatprep.mubr.bf16.mxu1 %v1451_v37  ;;  %v1822_v55 = vld [vmem:[%s2371_s1 + $0x1d8] sm:$0xff]   ;;  %v1825_v58 = vld [vmem:[%s2371_s1 + $0x150] sm:$0xff]   ;;  %v1829_v62 = vld [vmem:[%s2371_s1 + $0x148] sm:$0xff]  }
  0x13   :  { %v1823_v56 = vld [vmem:[%s2371_s1 + $0x118] sm:$0xff]   ;;  %v1826_v59 = vld [vmem:[%s2371_s1 + $0x1d0] sm:$0xff]   ;;  %v1830_v63 = vld [vmem:[%s2371_s1 + $0x1c8] sm:$0xff]  }
  0x14   :  { %1601 = vmatpush3.bf16.msra.mxu0 %v1787_v18  ;;  %v1824_v57 = vld [vmem:[%s2371_s1 + $0x198] sm:$0xff]   ;;  %v1827_v60 = vld [vmem:[%s2371_s1 + $0x110] sm:$0xff]   ;;  %v1831_v0 = vld [vmem:[%s2371_s1 + $0x108] sm:$0xff]  }
  0x15   :  { %1623 = vmatpush3.bf16.msra.mxu1 %v1788_v19  ;;  %1602 = vmatprep.subr.bf16.mxu0 %v1789_v20  ;;  %v1828_v61 = vld [vmem:[%s2371_s1 + $0x190] sm:$0xff]   ;;  %v1832_v1 = vld [vmem:[%s2371_s1 + $0x188] sm:$0xff]   ;;  %v1833_v2 = vld [vmem:[%s2371_s1 + $0x140] sm:$0xff]  }
  0x16   :  { %1624 = vmatprep.subr.bf16.mxu1 %v1790_v21  ;;  %v1834_v3 = vld [vmem:[%s2371_s1 + $0x1c0] sm:$0xff]   ;;  %v18_v6 = vld [vmem:[%s2370_s0 + $0x10] sm:$0xff]  ;;  %v19_v9 = vld [vmem:[%s2370_s0 + $0x18] sm:$0xff] }
  0x17   :  { %v1835_v4 = vld [vmem:[%s2371_s1 + $0x100] sm:$0xff]   ;;  %v1452_v7 = vcombine.low %v18_v6, %v18_v6  ;;  %v1453_v8 = vcombine.high %v18_v6, %v18_v6  ;;  %v1454_v10 = vcombine.low %v19_v9, %v19_v9  ;;  %v1455_v11 = vcombine.high %v19_v9, %v19_v9  ;;  %v1841_v12 = vld [vmem:[%s2371_s1 + $0x278] sm:$0xff]   ;;  %v1845_v16 = vld [vmem:[%s2371_s1 + $0x270] sm:$0xff]  }
  0x18   :  { %1603 = vmatpush3.bf16.msra.mxu0 %v1791_v22  ;;  %v1836_v5 = vld [vmem:[%s2371_s1 + $0x180] sm:$0xff]   ;;  %v1842_v13 = vld [vmem:[%s2371_s1 + $0x2f8] sm:$0xff]   ;;  %v1846_v17 = vld [vmem:[%s2371_s1 + $0x2f0] sm:$0xff]  }
  0x19   :  { %1625 = vmatpush3.bf16.msra.mxu1 %v1792_v23  ;;  %1604 = vmatprep.subr.bf16.mxu0 %v1793_v24  ;;  %v1843_v14 = vld [vmem:[%s2371_s1 + $0x238] sm:$0xff]   ;;  %v1847_v18 = vld [vmem:[%s2371_s1 + $0x230] sm:$0xff]   ;;  %v1849_v20 = vld [vmem:[%s2371_s1 + $0x268] sm:$0xff]  }
  0x1a   :  { %1626 = vmatprep.subr.bf16.mxu1 %v1794_v25  ;;  %v1844_v15 = vld [vmem:[%s2371_s1 + $0x2b8] sm:$0xff]   ;;  %v1848_v19 = vld [vmem:[%s2371_s1 + $0x2b0] sm:$0xff]   ;;  %v1850_v21 = vld [vmem:[%s2371_s1 + $0x2e8] sm:$0xff]  }
  0x1b   :  { %v1851_v22 = vld [vmem:[%s2371_s1 + $0x228] sm:$0xff]   ;;  %v1853_v24 = vld [vmem:[%s2371_s1 + $0x260] sm:$0xff]   ;;  %v1861_v32 = vld [vmem:[%s2371_s1 + $0x250] sm:$0xff]  }
  0x1c   :  { %1605 = vmatpush3.bf16.msra.mxu0 %v1795_v26  ;;  %v1852_v23 = vld [vmem:[%s2371_s1 + $0x2a8] sm:$0xff]   ;;  %v1854_v25 = vld [vmem:[%s2371_s1 + $0x2e0] sm:$0xff]   ;;  %v1862_v33 = vld [vmem:[%s2371_s1 + $0x2d0] sm:$0xff]  }
  0x1d   :  { %1627 = vmatpush3.bf16.msra.mxu1 %v1796_v27  ;;  %1606 = vmatprep.subr.bf16.mxu0 %v1797_v28  ;;  %v1855_v26 = vld [vmem:[%s2371_s1 + $0x220] sm:$0xff]   ;;  %v1857_v28 = vld [vmem:[%s2371_s1 + $0x258] sm:$0xff]   ;;  %v1864_v35 = vld [vmem:[%s2371_s1 + $0x290] sm:$0xff]  }
  0x1e   :  { %1628 = vmatprep.subr.bf16.mxu1 %v1798_v29  ;;  %v1856_v27 = vld [vmem:[%s2371_s1 + $0x2a0] sm:$0xff]   ;;  %v1858_v29 = vld [vmem:[%s2371_s1 + $0x2d8] sm:$0xff]   ;;  %v1866_v37 = vld [vmem:[%s2371_s1 + $0x2c8] sm:$0xff]  }
  0x1f   :  { %v1897_v6 = vld [vmem:[%s2371_s1 + $0x350] sm:$0xff]  }
  0x20   :  { %1607 = vmatpush3.bf16.msra.mxu0 %v1799_v30  ;;  %v1859_v30 = vld [vmem:[%s2371_s1 + $0x218] sm:$0xff]   ;;  %v1900_v9 = vld [vmem:[%s2371_s1 + $0x390] sm:$0xff]  }
  0x21   :  { %1629 = vmatpush3.bf16.msra.mxu1 %v1800_v31  ;;  %1636 = vmatprep.subr.bf16.mxu0 %v1805_v38  ;;  %v1860_v31 = vld [vmem:[%s2371_s1 + $0x298] sm:$0xff]   ;;  %v1867_v38 = vld [vmem:[%s2371_s1 + $0x208] sm:$0xff]  }
  0x22   :  { %1658 = vmatprep.subr.bf16.mxu1 %v1806_v39  ;;  %v1868_v39 = vld [vmem:[%s2371_s1 + $0x288] sm:$0xff]  }
  0x23   :  { %1144 = vmatmul.mubr.bf16.vlgmr.msra.gmra.mxu0 %v1448_v34  ;;  %v1863_v34 = vld [vmem:[%s2371_s1 + $0x210] sm:$0xff]  }
  0x24   :  { %1184 = vmatmul.mubr.bf16.vlgmr.msra.gmra.mxu1 %v1450_v36  ;;  %1637 = vmatpush3.bf16.msra.mxu0 %v1807_v40  ;;  %v1865_v36 = vld [vmem:[%s2371_s1 + $0x248] sm:$0xff]   ;;  %v1869_v40 = vld [vmem:[%s2371_s1 + $0x240] sm:$0xff]  }
  0x25   :  { %1659 = vmatpush3.bf16.msra.mxu1 %v1808_v41  ;;  %1638 = vmatprep.subr.bf16.mxu0 %v1809_v42  ;;  %v1870_v41 = vld [vmem:[%s2371_s1 + $0x2c0] sm:$0xff]  }
  0x26   :  { %1660 = vmatprep.subr.bf16.mxu1 %v1810_v43  ;;  %1223 = vmatprep.mubr.bf16.mxu0 %v1453_v8  ;;  %v1871_v42 = vld [vmem:[%s2371_s1 + $0x200] sm:$0xff]   ;;  %v1899_v8 = vld [vmem:[%s2371_s1 + $0x310] sm:$0xff]  }
  0x27   :  { %1263 = vmatprep.mubr.bf16.mxu1 %v1455_v11  ;;  %v1872_v43 = vld [vmem:[%s2371_s1 + $0x280] sm:$0xff]   ;;  %v1902_v11 = vld [vmem:[%s2371_s1 + $0x3c8] sm:$0xff]  }
  0x28   :  { %1639 = vmatpush3.bf16.msra.mxu0 %v1811_v44  ;;  %v20_v44 = vld [vmem:[%s2370_s0 + $0x20] sm:$0xff] }
  0x29   :  { %1661 = vmatpush3.bf16.msra.mxu1 %v1812_v45  ;;  %1640 = vmatprep.subr.bf16.mxu0 %v1813_v46  ;;  %v21_v45 = vld [vmem:[%s2370_s0 + $0x28] sm:$0xff]  ;;  %v1456_v46 = vcombine.low %v20_v44, %v20_v44 }
  0x2a   :  { %1662 = vmatprep.subr.bf16.mxu1 %v1814_v47  ;;  %v1457_v47 = vcombine.high %v20_v44, %v20_v44 }
  0x2c   :  { %1641 = vmatpush3.bf16.msra.mxu0 %v1815_v48  ;;  %v1458_v48 = vcombine.low %v21_v45, %v21_v45 }
  0x2d   :  { %1663 = vmatpush3.bf16.msra.mxu1 %v1816_v49  ;;  %1642 = vmatprep.subr.bf16.mxu0 %v1817_v50  ;;  %v1459_v49 = vcombine.high %v21_v45, %v21_v45  ;;  %v1877_v50 = vld [vmem:[%s2371_s1 + $0x378] sm:$0xff]  }
  0x2e   :  { %1664 = vmatprep.subr.bf16.mxu1 %v1818_v51  ;;  %v1878_v51 = vld [vmem:[%s2371_s1 + $0x3f8] sm:$0xff]  }
  0x30   :  { %1643 = vmatpush3.bf16.msra.mxu0 %v1819_v52  ;;  %v1879_v52 = vld [vmem:[%s2371_s1 + $0x338] sm:$0xff]  }
  0x31   :  { %1665 = vmatpush3.bf16.msra.mxu1 %v1820_v53  ;;  %1644 = vmatprep.subr.bf16.mxu0 %v1821_v54  ;;  %v1880_v53 = vld [vmem:[%s2371_s1 + $0x3b8] sm:$0xff]   ;;  %v1881_v54 = vld [vmem:[%s2371_s1 + $0x370] sm:$0xff]  }
  0x32   :  { %1666 = vmatprep.subr.bf16.mxu1 %v1822_v55  ;;  %v1882_v55 = vld [vmem:[%s2371_s1 + $0x3f0] sm:$0xff]  }
  0x34   :  { %1645 = vmatpush3.bf16.msra.mxu0 %v1823_v56  ;;  %v1883_v56 = vld [vmem:[%s2371_s1 + $0x330] sm:$0xff]  }
  0x35   :  { %1667 = vmatpush3.bf16.msra.mxu1 %v1824_v57  ;;  %1646 = vmatprep.subr.bf16.mxu0 %v1825_v58  ;;  %v1884_v57 = vld [vmem:[%s2371_s1 + $0x3b0] sm:$0xff]   ;;  %v1885_v58 = vld [vmem:[%s2371_s1 + $0x368] sm:$0xff]  }
  0x36   :  { %1668 = vmatprep.subr.bf16.mxu1 %v1826_v59  ;;  %v1886_v59 = vld [vmem:[%s2371_s1 + $0x3e8] sm:$0xff]  }
  0x38   :  { %1647 = vmatpush3.bf16.msra.mxu0 %v1827_v60  ;;  %v1887_v60 = vld [vmem:[%s2371_s1 + $0x328] sm:$0xff]  }
  0x39   :  { %1669 = vmatpush3.bf16.msra.mxu1 %v1828_v61  ;;  %1648 = vmatprep.subr.bf16.mxu0 %v1829_v62  ;;  %v1888_v61 = vld [vmem:[%s2371_s1 + $0x3a8] sm:$0xff]   ;;  %v1889_v62 = vld [vmem:[%s2371_s1 + $0x360] sm:$0xff]  }
  0x3a   :  { %1670 = vmatprep.subr.bf16.mxu1 %v1830_v63  ;;  %v1890_v63 = vld [vmem:[%s2371_s1 + $0x3e0] sm:$0xff]  }
  0x3c   :  { %1649 = vmatpush3.bf16.msra.mxu0 %v1831_v0  ;;  %v1891_v0 = vld [vmem:[%s2371_s1 + $0x320] sm:$0xff]  }
  0x3d   :  { %1671 = vmatpush3.bf16.msra.mxu1 %v1832_v1  ;;  %1650 = vmatprep.subr.bf16.mxu0 %v1833_v2  ;;  %v1892_v1 = vld [vmem:[%s2371_s1 + $0x3a0] sm:$0xff]   ;;  %v1893_v2 = vld [vmem:[%s2371_s1 + $0x358] sm:$0xff]  }
  0x3e   :  { %1672 = vmatprep.subr.bf16.mxu1 %v1834_v3  ;;  %v1894_v3 = vld [vmem:[%s2371_s1 + $0x3d8] sm:$0xff]  }
  0x40   :  { %1651 = vmatpush3.bf16.msra.mxu0 %v1835_v4  ;;  %v1895_v4 = vld [vmem:[%s2371_s1 + $0x318] sm:$0xff]  }
  0x41   :  { %1673 = vmatpush3.bf16.msra.mxu1 %v1836_v5  ;;  %1680 = vmatprep.subr.bf16.mxu0 %v1841_v12  ;;  %v1896_v5 = vld [vmem:[%s2371_s1 + $0x398] sm:$0xff]   ;;  %v1903_v12 = vld [vmem:[%s2371_s1 + $0x308] sm:$0xff]  }
  0x42   :  { %1702 = vmatprep.subr.bf16.mxu1 %v1842_v13  ;;  %v1904_v13 = vld [vmem:[%s2371_s1 + $0x388] sm:$0xff]  }
  0x43   :  { %1224 = vmatmul.mubr.bf16.vlgmr.msra.gmra.mxu0 %v1452_v7  ;;  %v1898_v7 = vld [vmem:[%s2371_s1 + $0x3d0] sm:$0xff]  }
  0x44   :  { %1264 = vmatmul.mubr.bf16.vlgmr.msra.gmra.mxu1 %v1454_v10  ;;  %1681 = vmatpush3.bf16.msra.mxu0 %v1843_v14  ;;  %v1901_v10 = vld [vmem:[%s2371_s1 + $0x348] sm:$0xff]   ;;  %v1905_v14 = vld [vmem:[%s2371_s1 + $0x340] sm:$0xff]  }
  0x45   :  { %1703 = vmatpush3.bf16.msra.mxu1 %v1844_v15  ;;  %1682 = vmatprep.subr.bf16.mxu0 %v1845_v16  ;;  %v1906_v15 = vld [vmem:[%s2371_s1 + $0x3c0] sm:$0xff]  }
  0x46   :  { %1704 = vmatprep.subr.bf16.mxu1 %v1846_v17  ;;  %1303 = vmatprep.mubr.bf16.mxu0 %v1457_v47  ;;  %v1907_v16 = vld [vmem:[%s2371_s1 + $0x300] sm:$0xff]  }
  0x47   :  { %1343 = vmatprep.mubr.bf16.mxu1 %v1459_v49  ;;  %v1908_v17 = vld [vmem:[%s2371_s1 + $0x380] sm:$0xff]  }
  0x48   :  { %1683 = vmatpush3.bf16.msra.mxu0 %v1847_v18  ;;  %v22_v18 = vld [vmem:[%s2370_s0 + $0x30] sm:$0xff] }
  0x49   :  { %1705 = vmatpush3.bf16.msra.mxu1 %v1848_v19  ;;  %1684 = vmatprep.subr.bf16.mxu0 %v1849_v20  ;;  %v23_v19 = vld [vmem:[%s2370_s0 + $0x38] sm:$0xff]  ;;  %v1460_v20 = vcombine.low %v22_v18, %v22_v18 }
  0x4a   :  { %1706 = vmatprep.subr.bf16.mxu1 %v1850_v21  ;;  %v1461_v21 = vcombine.high %v22_v18, %v22_v18 }
  0x4c   :  { %1685 = vmatpush3.bf16.msra.mxu0 %v1851_v22  ;;  %v1462_v22 = vcombine.low %v23_v19, %v23_v19 }
  0x4d   :  { %1707 = vmatpush3.bf16.msra.mxu1 %v1852_v23  ;;  %1686 = vmatprep.subr.bf16.mxu0 %v1853_v24 }
  0x4e   :  { %1708 = vmatprep.subr.bf16.mxu1 %v1854_v25 }
  0x50   :  { %1687 = vmatpush3.bf16.msra.mxu0 %v1855_v26 }
  0x51   :  { %1709 = vmatpush3.bf16.msra.mxu1 %v1856_v27  ;;  %1688 = vmatprep.subr.bf16.mxu0 %v1857_v28 }
  0x52   :  { %1710 = vmatprep.subr.bf16.mxu1 %v1858_v29 }
  0x54   :  { %1689 = vmatpush3.bf16.msra.mxu0 %v1859_v30 }
  0x55   :  { %1711 = vmatpush3.bf16.msra.mxu1 %v1860_v31  ;;  %1690 = vmatprep.subr.bf16.mxu0 %v1861_v32 }
  0x56   :  { %1712 = vmatprep.subr.bf16.mxu1 %v1862_v33 }
  0x58   :  { %1691 = vmatpush3.bf16.msra.mxu0 %v1863_v34 }
  0x59   :  { %1713 = vmatpush3.bf16.msra.mxu1 %v1864_v35  ;;  %1692 = vmatprep.subr.bf16.mxu0 %v1865_v36 }
  0x5a   :  { %1714 = vmatprep.subr.bf16.mxu1 %v1866_v37 }
  0x5c   :  { %1693 = vmatpush3.bf16.msra.mxu0 %v1867_v38 }
  0x5d   :  { %1715 = vmatpush3.bf16.msra.mxu1 %v1868_v39  ;;  %1694 = vmatprep.subr.bf16.mxu0 %v1869_v40 }
  0x5e   :  { %1716 = vmatprep.subr.bf16.mxu1 %v1870_v41 }
  0x60   :  { %1695 = vmatpush3.bf16.msra.mxu0 %v1871_v42 }
  0x61   :  { %1717 = vmatpush3.bf16.msra.mxu1 %v1872_v43  ;;  %1724 = vmatprep.subr.bf16.mxu0 %v1877_v50 }
  0x62   :  { %1746 = vmatprep.subr.bf16.mxu1 %v1878_v51 }
  0x63   :  { %1304 = vmatmul.mubr.bf16.vlgmr.msra.gmra.mxu0 %v1456_v46 }
  0x64   :  { %1344 = vmatmul.mubr.bf16.vlgmr.msra.gmra.mxu1 %v1458_v48  ;;  %1725 = vmatpush3.bf16.msra.mxu0 %v1879_v52 }
  0x65   :  { %1747 = vmatpush3.bf16.msra.mxu1 %v1880_v53  ;;  %1726 = vmatprep.subr.bf16.mxu0 %v1881_v54 }
  0x66   :  { %1748 = vmatprep.subr.bf16.mxu1 %v1882_v55 }
  0x68   :  { %1727 = vmatpush3.bf16.msra.mxu0 %v1883_v56 }
  0x69   :  { %1749 = vmatpush3.bf16.msra.mxu1 %v1884_v57  ;;  %1728 = vmatprep.subr.bf16.mxu0 %v1885_v58 }
  0x6a   :  { %1750 = vmatprep.subr.bf16.mxu1 %v1886_v59 }
  0x6c   :  { %1729 = vmatpush3.bf16.msra.mxu0 %v1887_v60 }
  0x6d   :  { %1751 = vmatpush3.bf16.msra.mxu1 %v1888_v61  ;;  %1730 = vmatprep.subr.bf16.mxu0 %v1889_v62 }
  0x6e   :  { %1752 = vmatprep.subr.bf16.mxu1 %v1890_v63 }
  0x70   :  { %1731 = vmatpush3.bf16.msra.mxu0 %v1891_v0 }
  0x71   :  { %1753 = vmatpush3.bf16.msra.mxu1 %v1892_v1  ;;  %1732 = vmatprep.subr.bf16.mxu0 %v1893_v2 }
  0x72   :  { %1754 = vmatprep.subr.bf16.mxu1 %v1894_v3 }
  0x74   :  { %1733 = vmatpush3.bf16.msra.mxu0 %v1895_v4 }
  0x75   :  { %1755 = vmatpush3.bf16.msra.mxu1 %v1896_v5  ;;  %1734 = vmatprep.subr.bf16.mxu0 %v1897_v6 }
  0x76   :  { %1756 = vmatprep.subr.bf16.mxu1 %v1898_v7 }
  0x78   :  { %1735 = vmatpush3.bf16.msra.mxu0 %v1899_v8 }
  0x79   :  { %1757 = vmatpush3.bf16.msra.mxu1 %v1900_v9  ;;  %1736 = vmatprep.subr.bf16.mxu0 %v1901_v10 }
  0x7a   :  { %1758 = vmatprep.subr.bf16.mxu1 %v1902_v11 }
  0x7c   :  { %1737 = vmatpush3.bf16.msra.mxu0 %v1903_v12 }
  0x7d   :  { %1759 = vmatpush3.bf16.msra.mxu1 %v1904_v13  ;;  %1738 = vmatprep.subr.bf16.mxu0 %v1905_v14 }
  0x7e   :  { %1760 = vmatprep.subr.bf16.mxu1 %v1906_v15 }
  0x80   :  { %1739 = vmatpush3.bf16.msra.mxu0 %v1907_v16 }
  0x81   :  { %1761 = vmatpush3.bf16.msra.mxu1 %v1908_v17 }
  0x82   :  { %8 = vsyncpa [#allocation3], 0  ;;  %v1463_v23 = vcombine.high %v23_v19, %v23_v19  ;;  %1383 = vmatprep.mubr.bf16.mxu0 %v1461_v21  ;;  %v1447_v26 = vld [vmem:[%s2372_s2] ss:$0 sm:$0xff]  ;;  %s1935_s0 = smov [#allocation2]   ;;  %vm1431_vm0 = vcmask 64512  }
  0x83   :  { %1384 = vmatmul.mubr.bf16.vlgmr.msra.gmra.mxu0 %v1460_v20  ;;  %s1439_s2 = sshll.u32 %s1935_s0, 4  ;;  %s1440_s2 = int_to_ptr.vmem [resolvable:$true] %s1439_s2 }
  0x84   :  { %1423 = vmatprep.mubr.bf16.mxu1 %v1463_v23  ;;  %s1913_s15 = scalar_lea.vmem %s1440_s2, 128  ;;  %p1918_p1 = scmp.lt.s32.totalorder %s1440_s2, %s1440_s2 }
  0x85   :  { %1424 = vmatmul.mubr.bf16.vlgmr.msra.gmra.mxu1 %v1462_v22  ;;  %p1914_p0 = scmp.ne.s32.totalorder %s1440_s2, %s1913_s15  ;;  %p1919_p2 = scmp.lt.s32.totalorder %s1913_s15, %s1913_s15 }
  0x87   :  { %p1920_p3 = por %p1919_p2, %p1918_p1 }
  0x89   :  { %p1921_p4 = pnand %p1920_p3, %p1914_p0 }
  0xe3   :  { %v1608_v24 = vpop.f32.mrf.mxu0 }
  0xe4   :  { %v1630_v25 = vpop.f32.mrf.mxu1 }
  0xe5   :  { %v1609_v27 = vpop.f32.mrf.mxu0 }
  0xe6   :  { %v1631_v28 = vpop.f32.mrf.mxu1  ;;  %v1610_v29 = vadd.f32 %v1609_v27, %v1608_v24 }
  0xe7   :  { %v1632_v30 = vadd.f32 %v1631_v28, %v1630_v25  ;;  %v1611_v31 = vpop.f32.mrf.mxu0 }
  0xe8   :  { %v1633_v32 = vpop.f32.mrf.mxu1  ;;  %v1146_v33 = vadd.f32 %v1610_v29, %v1447_v26 }
  0xe9   :  { %v1612_v34 = vpop.f32.mrf.mxu0 }
  0xea   :  { %v1634_v35 = vpop.f32.mrf.mxu1  ;;  %v1186_v36 = vadd.f32 %v1632_v30, %v1146_v33 }
 0x103   :  { %v1652_v37 = vpop.f32.mrf.mxu0 }
 0x104   :  { %v1674_v38 = vpop.f32.mrf.mxu1 }
 0x105   :  { %v1653_v39 = vpop.f32.mrf.mxu0 }
 0x106   :  { %v1675_v40 = vpop.f32.mrf.mxu1  ;;  %v1654_v53 = vadd.f32 %v1653_v39, %v1652_v37 }
 0x107   :  { %v1655_v41 = vpop.f32.mrf.mxu0  ;;  %v1676_v55 = vadd.f32 %v1675_v40, %v1674_v38 }
 0x108   :  { %v1677_v42 = vpop.f32.mrf.mxu1  ;;  %v1226_v54 = vadd.f32 %v1654_v53, %v1186_v36 }
 0x109   :  { %v1656_v43 = vpop.f32.mrf.mxu0 }
 0x10a   :  { %v1678_v44 = vpop.f32.mrf.mxu1  ;;  %v1266_v57 = vadd.f32 %v1676_v55, %v1226_v54 }
 0x123   :  { %v1696_v45 = vpop.f32.mrf.mxu0 }
 0x124   :  { %v1718_v46 = vpop.f32.mrf.mxu1 }
 0x125   :  { %v1697_v47 = vpop.f32.mrf.mxu0 }
 0x126   :  { %v1719_v48 = vpop.f32.mrf.mxu1  ;;  %v1698_v56 = vadd.f32 %v1697_v47, %v1696_v45 }
 0x127   :  { %v1699_v49 = vpop.f32.mrf.mxu0  ;;  %v1720_v59 = vadd.f32 %v1719_v48, %v1718_v46 }
 0x128   :  { %v1721_v50 = vpop.f32.mrf.mxu1  ;;  %v1306_v58 = vadd.f32 %v1698_v56, %v1266_v57 }
 0x129   :  { %v1700_v51 = vpop.f32.mrf.mxu0 }
 0x12a   :  { %v1722_v52 = vpop.f32.mrf.mxu1  ;;  %v1346_v63 = vadd.f32 %v1720_v59, %v1306_v58 }
 0x143   :  { %v1740_v60 = vpop.f32.mrf.mxu0 }
 0x145   :  { %v1762_v61 = vpop.f32.mrf.mxu1  ;;  %v1741_v62 = vpop.f32.mrf.mxu0 }
 0x146   :  { %v1742_v0 = vadd.f32 %v1741_v62, %v1740_v60 }
 0x147   :  { %v1763_v1 = vpop.f32.mrf.mxu1  ;;  %v1743_v2 = vpop.f32.mrf.mxu0 }
 0x148   :  { %v1386_v3 = vadd.f32 %v1742_v0, %v1346_v63  ;;  %v1764_v4 = vadd.f32 %v1763_v1, %v1762_v61 }
 0x149   :  { %v1765_v5 = vpop.f32.mrf.mxu1  ;;  %v1744_v6 = vpop.f32.mrf.mxu0 }
 0x14a   :  { %v1426_v7 = vadd.f32 %v1764_v4, %v1386_v3 }
 0x14b   :  { %v1766_v8 = vpop.f32.mrf.mxu1 }
 0x14c   :  { %1432 = vst.msk [vmem:[#allocation2] sm:$0xff] %vm1431_vm0, %v1426_v7 }
 0x14d   :  { %1924 = shalt.err (!%p1921_p4)
}
 0x14e   :  { %1442 = dma.vmem_to_hbm [thread:$0]  %s1440_s2, 128, %s2373_s3, [#allocation3]  }
 0x14f   :  { %1933 = dma.done.wait [#allocation3], 128  }
 0x150   :  { %1934 = vsyncadd [#allocation3], 4294967168 }
 0x151   :  { %1446 = vsyncpa [#allocation3], 1 }

</bundles_post_ra>
